<compile_context>
chip_gen: v5e
topology: v5e:2x2
jax: 0.10.0
libtpu: 0.0.40
codegen_flags: <defaults>
</compile_context>

<pallas_src>
from math import sqrt

import jax
import jax.numpy as jnp
from jax.experimental import pallas as pl
from jax.experimental.pallas import tpu as pltpu


def planar_map_kernel(b_ref, z_ref, u_ref, w_ref, fz_ref, logdet_ref):
    b = b_ref[0]                       # scalar bias (SMEM, f32)
    u = u_ref[...]                     # (1, D) f32, resident across all steps
    w = w_ref[...]                     # (1, D) f32, resident across all steps

    z = z_ref[...]                     # (TB, D) in the input dtype (f32 / bf16)

    # wz = row-wise dot(z, w).  z * w promotes to f32 (w is f32), so the
    # accumulation is f32 without materializing a full-block f32 copy of z.
    wz = jnp.sum(z * w, axis=-1, keepdims=True)        # (TB, 1) f32
    t = jnp.tanh(wz + b)                                # (TB, 1) f32, EUP

    # f_z = z + u * tanh(wz + b); the (TB, D) part stays in the input dtype.
    fz_ref[...] = z + (u * t).astype(z_ref.dtype)

    # logdet = log(|1 + psi @ u.T|) = log(|1 + (1 - t^2) * (w . u)|)
    # w.u is batch-independent; the D-length mul + XLU reduce hides under DMA.
    wu = jnp.sum(w * u)
    # TODO(synk): logdet is stored as lane-sparse (TB, 1) blocks; only v5e's
    # single vst slot would care -- left as-is (tiny vs. the f_z stores).
    logdet_ref[...] = jnp.log(jnp.abs(1.0 + (1.0 - t * t) * wu))


def _pick_batch_tile(B, D, z_itemsize):
    """Pick the batch tile and the matching scoped-VMEM budget.

    Per grid step the VMEM footprint is roughly:
      z in    : 2 (double-buffered) * tb * D * itemsize
      f_z out : 2 (double-buffered) * tb * D * itemsize
      body    : ~2 full-block temporaries (counted at f32 width, conservative)
    plus small resident u / w / logdet blocks.
    """
    bytes_per_row = D * (4 * z_itemsize + 2 * 4)
    # ~24 MiB working set: sits at the tile-size knee (>=85% of HBM roofline per
    # measured data) while staying well under v7x's 64 MiB physical VMEM per TC.
    target_total = 24 << 20
    tb = target_total // max(1, bytes_per_row)
    tb = max(8, (tb // 8) * 8)

    if tb >= B:
        if B >= 16:
            # Keep >=2 grid steps so the "parallel" axis can shard across
            # v7x's 2 TensorCores; harmless on single-TC v5e/v6e.
            tb = max(8, ((B // 2) // 8) * 8)
        else:
            tb = B  # full batch in one block (still satisfies the (8,128) rule)

    vmem_limit = int(bytes_per_row * tb * 1.5) + (4 << 20)
    vmem_limit = min(max(vmem_limit, 16 << 20), 48 << 20)
    return tb, vmem_limit


def planar_map_forward(z, u, w, b):
    """z: (B, D); u, w: (1, D); b: scalar. Returns (f_z (B, D), logdet (B, 1) f32)."""
    B, D = z.shape
    u = u.astype(jnp.float32)
    w = w.astype(jnp.float32)
    b_arr = jnp.asarray(b, dtype=jnp.float32).reshape(1)   # robust to python floats

    z_itemsize = jnp.dtype(z.dtype).itemsize
    tb, vmem_limit = _pick_batch_tile(B, D, z_itemsize)
    nb = pl.cdiv(B, tb)

    # TODO(synk): for real workloads with D not a multiple of 128, re-layout in
    # the wrapper (lane-dense last dim) to avoid masked vst.msk stores on f_z.

    cost = pl.CostEstimate(
        flops=6 * B * D,
        transcendentals=2 * B,                              # tanh + log per row
        bytes_accessed=2 * B * D * z_itemsize + B * 4 + 2 * D * 4,
    )

    f_z, logdet = pl.pallas_call(
        planar_map_kernel,
        out_shape=(
            jax.ShapeDtypeStruct((B, D), z.dtype),
            jax.ShapeDtypeStruct((B, 1), jnp.float32),
        ),
        grid_spec=pltpu.PrefetchScalarGridSpec(
            num_scalar_prefetch=0,
            grid=(nb,),
            in_specs=[
                pl.BlockSpec(memory_space=pltpu.MemorySpace.SMEM),   # b (scalar)
                pl.BlockSpec((tb, D), lambda i: (i, 0)),             # z (streamed)
                pl.BlockSpec((1, D), lambda i: (0, 0)),              # u (resident)
                pl.BlockSpec((1, D), lambda i: (0, 0)),              # w (resident)
            ],
            out_specs=[
                pl.BlockSpec((tb, D), lambda i: (i, 0)),             # f_z
                pl.BlockSpec((tb, 1), lambda i: (i, 0)),             # logdet
            ],
        ),
        compiler_params=pltpu.CompilerParams(
            dimension_semantics=("parallel",),
            vmem_limit_bytes=vmem_limit,
        ),
        cost_estimate=cost,
    )(b_arr, z, u, w)
    return f_z, logdet


def reference_forward(z, u, w, b):
    """Pure-JAX reference mirroring the PyTorch forward exactly."""
    wz = jnp.sum(z * w, axis=-1, keepdims=True)
    t = jnp.tanh(wz + b)
    f_z = z + u * t
    psi = w * (1.0 - t ** 2)
    logdet = jnp.log(jnp.abs(1.0 + jnp.sum(psi * u, axis=-1, keepdims=True)))
    return f_z, logdet


if __name__ == "__main__":
    batch, dim = 8, 32

    key = jax.random.PRNGKey(0)
    kz, ku, kw, kb = jax.random.split(key, 4)

    # Parameter init matching reset_parameters(): U(-a, a), a = sqrt(6/dim)
    a = sqrt(6.0 / dim)
    u = jax.random.uniform(ku, (1, dim), jnp.float32, minval=-a, maxval=a)
    w = jax.random.uniform(kw, (1, dim), jnp.float32, minval=-a, maxval=a)
    b = jax.random.uniform(kb, (), jnp.float32, minval=-a, maxval=a)

    z = jax.random.normal(kz, (batch, dim), jnp.float32)

    f_z, logdet = planar_map_forward(z, u, w, b)
    jax.block_until_ready((f_z, logdet))

    f_ref, ld_ref = reference_forward(z, u, w, b)
    assert f_z.shape == (batch, dim) and logdet.shape == (batch, 1)
    assert jnp.allclose(f_z, f_ref, atol=1e-5, rtol=1e-5)
    assert jnp.allclose(logdet, ld_ref, atol=1e-5, rtol=1e-5)

    print("KERNEL_OK")
</pallas_src>

<mosaic_0001>
module attributes {stable_mosaic.version = 11 : i64} {
  func.func @planar_map_kernel(%arg0: i32, %arg1: memref<1xf32, #tpu.memory_space<smem>>, %arg2: memref<8x32xf32, #tpu.memory_space<vmem>>, %arg3: memref<1x32xf32, #tpu.memory_space<vmem>>, %arg4: memref<1x32xf32, #tpu.memory_space<vmem>>, %arg5: memref<8x32xf32, #tpu.memory_space<vmem>>, %arg6: memref<8x1xf32, #tpu.memory_space<vmem>>) attributes {dimension_semantics = [#tpu.dimension_semantics<parallel>], iteration_bounds = array<i64: 1>, scalar_prefetch = 0 : i64, scratch_operands = 0 : i64, tpu.core_type = #tpu.core_type<tc>, window_params = [{transform_indices = @transform_0, window_bounds = array<i64: 1>}, {transform_indices = @transform_1, window_bounds = array<i64: 8, 32>}, {pipeline_mode = #tpu.pipeline_mode<synchronous>, transform_indices = @transform_2, window_bounds = array<i64: 1, 32>}, {pipeline_mode = #tpu.pipeline_mode<synchronous>, transform_indices = @transform_3, window_bounds = array<i64: 1, 32>}, {transform_indices = @transform_4, window_bounds = array<i64: 8, 32>}, {transform_indices = @transform_5, window_bounds = array<i64: 8, 1>}]} {
    %c0 = arith.constant 0 : index
    %0 = memref.load %arg1[%c0] : memref<1xf32, #tpu.memory_space<smem>>
    %c0_0 = arith.constant 0 : index
    %c0_1 = arith.constant 0 : index
    %1 = vector.load %arg3[%c0_0, %c0_1] : memref<1x32xf32, #tpu.memory_space<vmem>>, vector<1x32xf32>
    %c0_2 = arith.constant 0 : index
    %c0_3 = arith.constant 0 : index
    %2 = vector.load %arg4[%c0_2, %c0_3] : memref<1x32xf32, #tpu.memory_space<vmem>>, vector<1x32xf32>
    %c0_4 = arith.constant 0 : index
    %c0_5 = arith.constant 0 : index
    %3 = vector.load %arg2[%c0_4, %c0_5] : memref<8x32xf32, #tpu.memory_space<vmem>>, vector<8x32xf32>
    %4 = vector.broadcast %2 : vector<1x32xf32> to vector<8x32xf32>
    %5 = arith.mulf %3, %4 : vector<8x32xf32>
    %cst = arith.constant dense<0.000000e+00> : vector<8xf32>
    %6 = vector.multi_reduction <add>, %5, %cst [1] : vector<8x32xf32> to vector<8xf32>
    %7 = vector.shape_cast %6 : vector<8xf32> to vector<8x1xf32>
    %8 = vector.broadcast %0 : f32 to vector<8x1xf32>
    %9 = arith.addf %7, %8 : vector<8x1xf32>
    %10 = math.tanh %9 : vector<8x1xf32>
    %11 = vector.broadcast %1 : vector<1x32xf32> to vector<8x32xf32>
    %12 = vector.broadcast %10 : vector<8x1xf32> to vector<8x32xf32>
    %13 = arith.mulf %11, %12 : vector<8x32xf32>
    %14 = arith.addf %3, %13 : vector<8x32xf32>
    %c0_6 = arith.constant 0 : index
    %c0_7 = arith.constant 0 : index
    %15 = vector.load %arg5[%c0_6, %c0_7] : memref<8x32xf32, #tpu.memory_space<vmem>>, vector<8x32xf32>
    tpu.vector_store %arg5[%c0_6, %c0_7], %14 {strides = array<i32>} : memref<8x32xf32, #tpu.memory_space<vmem>>, vector<8x32xf32>,
    %16 = arith.mulf %2, %1 : vector<1x32xf32>
    %17 = vector.shape_cast %16 : vector<1x32xf32> to vector<1x1x32xf32>
    %cst_8 = arith.constant dense<0.000000e+00> : vector<1xf32>
    %18 = vector.multi_reduction <add>, %17, %cst_8 [1, 2] : vector<1x1x32xf32> to vector<1xf32>
    %19 = vector.shape_cast %18 : vector<1xf32> to vector<1x1x1xf32>
    %20 = vector.extract %19[0, 0, 0] : f32 from vector<1x1x1xf32>
    %21 = arith.mulf %10, %10 : vector<8x1xf32>
    %cst_9 = arith.constant 1.000000e+00 : f32
    %22 = vector.broadcast %cst_9 : f32 to vector<8x1xf32>
    %23 = arith.subf %22, %21 : vector<8x1xf32>
    %24 = vector.broadcast %20 : f32 to vector<8x1xf32>
    %25 = arith.mulf %23, %24 : vector<8x1xf32>
    %cst_10 = arith.constant 1.000000e+00 : f32
    %26 = vector.broadcast %cst_10 : f32 to vector<8x1xf32>
    %27 = arith.addf %26, %25 : vector<8x1xf32>
    %28 = math.absf %27 : vector<8x1xf32>
    %29 = math.log %28 : vector<8x1xf32>
    %c0_11 = arith.constant 0 : index
    %c0_12 = arith.constant 0 : index
    %30 = vector.load %arg6[%c0_11, %c0_12] : memref<8x1xf32, #tpu.memory_space<vmem>>, vector<8x1xf32>
    tpu.vector_store %arg6[%c0_11, %c0_12], %29 {strides = array<i32>} : memref<8x1xf32, #tpu.memory_space<vmem>>, vector<8x1xf32>,
    return
  }
  func.func @transform_0(%arg0: i32) -> i32 {
    %c0_i32 = arith.constant 0 : i32
    %c0_i32_0 = arith.constant 0 : i32
    return %c0_i32 : i32
  }
  func.func @transform_1(%arg0: i32) -> (i32, i32) {
    %c0_i32 = arith.constant 0 : i32
    %c0_i32_0 = arith.constant 0 : i32
    return %arg0, %c0_i32 : i32, i32
  }
  func.func @transform_2(%arg0: i32) -> (i32, i32) {
    %c0_i32 = arith.constant 0 : i32
    %c0_i32_0 = arith.constant 0 : i32
    %c0_i32_1 = arith.constant 0 : i32
    return %c0_i32, %c0_i32_0 : i32, i32
  }
  func.func @transform_3(%arg0: i32) -> (i32, i32) {
    %c0_i32 = arith.constant 0 : i32
    %c0_i32_0 = arith.constant 0 : i32
    %c0_i32_1 = arith.constant 0 : i32
    return %c0_i32, %c0_i32_0 : i32, i32
  }
  func.func @transform_4(%arg0: i32) -> (i32, i32) {
    %c0_i32 = arith.constant 0 : i32
    %c0_i32_0 = arith.constant 0 : i32
    return %arg0, %c0_i32 : i32, i32
  }
  func.func @transform_5(%arg0: i32) -> (i32, i32) {
    %c0_i32 = arith.constant 0 : i32
    %c0_i32_0 = arith.constant 0 : i32
    return %arg0, %c0_i32 : i32, i32
  }
}

</mosaic_0001>

<bundles_post_ra>
// kernel: tpu_custom_call.1
= control target key start
LH: loop header
LB: loop body
LE: loop exit
PB: predicated region body
PF: predicated region fallthrough
CT: control target
= control target key end

     0   :  { %12 = vsyncpa [#allocation4], 0  ;;  %s219_s0 = inlined_call_operand.<no memory space> [shape: f32[1], index: 0, kind: input, shape index: {}]   ;;  %s220_s1 = inlined_call_operand.hbm [shape: f32[8,32], index: 1, kind: input, shape index: {}]   ;;  %s221_s2 = inlined_call_operand.vmem [shape: f32[1,32], index: 2, kind: input, shape index: {}]   ;;  %s222_s3 = inlined_call_operand.vmem [shape: f32[1,32], index: 3, kind: input, shape index: {}]   ;;  %s223_s4 = inlined_call_operand.hbm [shape: f32[8,32], index: 4, kind: output, shape index: {0}]   ;;  %s224_s5 = inlined_call_operand.vmem [shape: f32[8,1], index: 5, kind: output, shape index: {1}]  }
   0x1   :  { %13 = vsyncpa [#allocation5], 0  ;;  %s21_s20 = sshll.u32 %s220_s1, 4  ;;  %s161_s21 = smov [#allocation3]   ;;  %s22_s20 = int_to_ptr.hbm [resolvable:$true] %s21_s20 }
   0x2   :  { %s23_s22 = sshll.u32 %s161_s21, 4  ;;  %s24_s22 = int_to_ptr.vmem [resolvable:$true] %s23_s22 }
   0x3   :  { %26 = dma.hbm_to_vmem [thread:$0]  %s22_s20, 128, %s24_s22, [#allocation4]  }
   0x4   :  { %157 = dma.done.wait [#allocation4], 128  }
   0x5   :  { %158 = vsyncadd [#allocation4], 4294967168  ;;  %v36_v0 = vld [vmem:[%s221_s2] sm:$0x1]  ;;  %vm57_vm0 = vcmask 253952   ;;  %vm43_vm1 = vcmask 261120   ;;  %v47_v14 = vstv %s219_s0 }
   0x6   :  { %v37_v1 = vld [vmem:[%s222_s3] sm:$0x1]  ;;  %s162_s6 = smov [#allocation6]   ;;  %s85_s10 = sshll.u32 %s223_s4, 4  ;;  %vm76_vm2 = vcmask 7168   ;;  %s86_s10 = int_to_ptr.hbm [resolvable:$true] %s85_s10 }
   0x7   :  { %v103_v2 = vld [vmem:[%s222_s3] ss:$0 sm:$0xff]  ;;  %v56_v3 = vmul.f32 %v37_v1, %v36_v0  ;;  %s83_s7 = sshll.u32 %s162_s6, 4  ;;  %s84_s7 = int_to_ptr.vmem [resolvable:$true] %s83_s7 }
   0x8   :  { %v38_v4 = vld [vmem:[#allocation3] sm:$0xff] }
   0x9   :  { %v58_v5 = vsel %vm57_vm0, %v56_v3, 0.0  ;;  %v42_v6 = vmul.f32 %v103_v2, %v38_v4  ;;  %v104_v18 = vld [vmem:[%s221_s2] ss:$0 sm:$0xff] }
   0xa   :  { %59 = vadd.xlane.f32.xlu0 %v58_v5 }
   0xb   :  { %v44_v7 = vsel %vm43_vm1, %v42_v6, 0.0 }
  0x12   :  { %45 = vadd.xlane.f32.xlu0 %v44_v7 }
  0x7d   :  { %v60_v8 = vpop.xlane.xlu0 %59 }
  0x7e   :  { %v61_v9 = vrot.slane %v60_v8, 4 }
  0x80   :  { %v62_v10 = vadd.f32 %v61_v9, %v60_v8 }
  0x82   :  { %v63_v11 = vrot.slane %v62_v10, 2 }
  0x84   :  { %v64_v12 = vadd.f32 %v63_v11, %v62_v10 }
  0x85   :  { %v46_v15 = vpop.xlane.xlu0 %45 }
  0x86   :  { %v65_v13 = vrot.slane %v64_v12, 1  ;;  %v48_v17 = vadd.f32 %v47_v14, %v46_v15 }
  0x88   :  { %v66_v16 = vadd.f32 %v65_v13, %v64_v12  ;;  %105 = vtanh.f32 %v48_v17 }
  0x8a   :  { %99 = vpush %v66_v16 }
  0x8e   :  { %v106_v19 = vpop.eup %105 }
  0x8f   :  { %v53_v20 = vmul.f32 %v106_v19, %v104_v18  ;;  %v68_v22 = vmul.f32 %v106_v19, %v106_v19 }
  0x91   :  { %v54_v21 = vadd.f32 %v53_v20, %v38_v4  ;;  %v69_v23 = vsub.f32 1.0, %v68_v22 }
  0x93   :  { %55 = vst.msk [vmem:[#allocation6] sm:$0xff] %vm43_vm1, %v54_v21 }
  0x94   :  { %88 = dma.vmem_to_hbm [thread:$0]  %s84_s7, 128, %s86_s10, [#allocation5]  }
  0xbb   :  { %s100_s0 = spop %99 }
  0xbc   :  { %v70_v24 = vstv %s100_s0 }
  0xbd   :  { %v71_v25 = vmul.f32 %v70_v24, %v69_v23 }
  0xbf   :  { %v72_v26 = vadd.f32 1.0, %v71_v25 }
  0xc1   :  { %v73_v27 = vand.u32 2147483647, %v72_v26 }
  0xc3   :  { %107 = vlog2.f32 %v73_v27 }
  0xc9   :  { %v108_v28 = vpop.eup %107 }
  0xca   :  { %v75_v29 = vmul.f32 0.6931472, %v108_v28 }
  0xcc   :  { %77 = vst.msk [vmem:[%s224_s5] sm:$0xff] %vm76_vm2, %v75_v29 }
  0xcd   :  { %159 = dma.done.wait [#allocation5], 128  }
  0xce   :  { %160 = vsyncadd [#allocation5], 4294967168 }
  0xcf   :  { %97 = vsyncpa [#allocation4], 1 }
  0xd0   :  { %98 = vsyncpa [#allocation5], 1 }

</bundles_post_ra>
